<compile_context>
chip_gen: v6e
topology: v6e:2x2x1
jax: 0.10.0
libtpu: 0.0.40
codegen_flags: <defaults>
</compile_context>

<pallas_src>
import jax
import jax.numpy as jnp
from jax import lax
from jax.experimental import pallas as pl
from jax.experimental.pallas import tpu as pltpu  # noqa: F401

# ----------------------------- model dims (small) ---------------------------
B = 2          # batch
C = 3          # image channels (RGB)
H = W = 16     # spatial
PATCH = 8      # patch size
N = (H // PATCH) * (W // PATCH)   # number of image patches = 4
P = C * PATCH * PATCH             # patch dim = 192
D = 32         # embed dim
NQ = 8         # number of query tokens (Q-Former queries)
T = 4          # number of text tokens
DP = 16        # vision_proj output dim
VOCAB = 64     # synthetic vocab

D2 = 2 * D                 # fused [K|V] width = 64
ROW_Q0 = D                 # row of scaled CLS query inside w_rest
ROW_BKV = D + 1            # row of fused image K|V bias
ROW_BOUT = D + 2           # row of fused output bias
WREST_ROWS = D + 3         # 35
WREST_W = D2 + DP          # 80


# ------------------------------- Pallas kernel ------------------------------
def blip2_kernel(
    patches_ref,   # (B*N, P)  raw (un-normalized) patches, batch rows stacked
    text_ref,      # (T, D)    text token embeddings (batch-invariant)
    wimg_ref,      # (P, 2D)   (1/std * wpatch) @ [wk|wv]   (mean/std folded)
    wrest_ref,     # (WREST_ROWS, WREST_W) packed small weights / biases
    out_ref,       # (B, DP)   normalized CLS features for the whole batch
):
    f32 = jnp.float32

    # --- unpack the small weight slab with static views ---
    wr = wrest_ref[...]
    wkv     = wr[:D, :D2]                     # (D, 2D)  [wk|wv] for text K|V
    wo_proj = wr[:D, D2:D2 + DP]              # (D, DP)  wo @ wproj
    q0      = wr[ROW_Q0:ROW_Q0 + 1, :D]       # (1, D)   (qcls @ wq) / sqrt(D)
    b_kv    = wr[ROW_BKV:ROW_BKV + 1, :D2]    # (1, 2D)  fused image K|V bias
    b_out   = wr[ROW_BOUT:ROW_BOUT + 1, :DP]  # (1, DP)  qcls@wproj + bproj

    # --- fused image K|V straight from raw patches (patch-embed folded in) ---
    kv_img = jnp.dot(patches_ref[...], wimg_ref[...],
                     preferred_element_type=f32) + b_kv          # (B*N, 2D)
    k_img, v_img = kv_img[:, :D], kv_img[:, D:]

    # --- fused text K|V, batch-invariant, computed exactly once ---
    kv_txt = jnp.dot(text_ref[...], wkv, preferred_element_type=f32)  # (T, 2D)
    k_txt, v_txt = kv_txt[:, :D], kv_txt[:, D:]

    # --- scores for the CLS query; contract last dims (no explicit .T) ---
    dn = (((1,), (1,)), ((), ()))
    s_img = lax.dot_general(q0, k_img, dn, preferred_element_type=f32)  # (1, B*N)
    s_txt = lax.dot_general(q0, k_txt, dn, preferred_element_type=f32)  # (1, T)

    # --- vectorized per-batch softmax over [image_b keys, shared text keys]
    #     via a block-diagonal masked weight matrix (no Python loop). ---
    rows = lax.broadcasted_iota(jnp.int32, (B, B * N), 0)
    cols = lax.broadcasted_iota(jnp.int32, (B, B * N), 1)
    blk_mask = (cols >= rows * N) & (cols < (rows + 1) * N)       # (B, B*N)

    s_img_b = jnp.broadcast_to(s_img, (B, B * N))
    s_masked = jnp.where(blk_mask, s_img_b, jnp.float32(-1e30))   # (B, B*N)

    m_img = jnp.max(s_masked, axis=-1, keepdims=True)             # (B, 1)
    m_txt = jnp.max(s_txt, axis=-1, keepdims=True)                # (1, 1)
    m = jnp.maximum(m_img, m_txt)                                 # (B, 1)

    w_img = jnp.exp(s_masked - m)                                 # (B, B*N), 0 off-block
    e_txt = jnp.exp(s_txt - m)                                    # (B, T)

    denom = (jnp.sum(w_img, axis=-1, keepdims=True)
             + jnp.sum(e_txt, axis=-1, keepdims=True))            # (B, 1)

    att = (jnp.dot(w_img, v_img, preferred_element_type=f32)
           + jnp.dot(e_txt, v_txt, preferred_element_type=f32))   # (B, D)
    attn = att * pl.reciprocal(denom, approx=False)               # exact recip

    # --- fused output-proj + residual + vision_proj, then L2 normalize ---
    proj = jnp.dot(attn, wo_proj, preferred_element_type=f32) + b_out   # (B, DP)
    nrm = jnp.sqrt(jnp.sum(proj * proj, axis=-1, keepdims=True))
    out_ref[...] = proj / jnp.maximum(nrm, 1e-12)


# --------------------------------- params ------------------------------------
def init_params(key):
    ks = jax.random.split(key, 10)
    s = 0.05
    return {
        "tok_emb": s * jax.random.normal(ks[0], (VOCAB, D), jnp.float32),
        "queries": s * jax.random.normal(ks[1], (NQ, D), jnp.float32),
        "wpatch": s * jax.random.normal(ks[2], (P, D), jnp.float32),
        "bpatch": jnp.zeros((1, D), jnp.float32),
        "wq": s * jax.random.normal(ks[3], (D, D), jnp.float32),
        "wk": s * jax.random.normal(ks[4], (D, D), jnp.float32),
        "wv": s * jax.random.normal(ks[5], (D, D), jnp.float32),
        "wo": s * jax.random.normal(ks[6], (D, D), jnp.float32),
        "wproj": s * jax.random.normal(ks[7], (D, DP), jnp.float32),
        "bproj": jnp.zeros((1, DP), jnp.float32),
    }


def pack_params(params):
    """One-time (init-time) weight folding + packing into 2 slabs."""
    mean = jnp.array([0.48145466, 0.4578275, 0.40821073], jnp.float32)
    std = jnp.array([0.26862954, 0.26130258, 0.27577711], jnp.float32)

    # patch-vector layout is (c, ph, pw) -> channel of dim p is p // (PATCH*PATCH)
    ch = jnp.repeat(jnp.arange(C), PATCH * PATCH)                  # (P,)
    mean_vec = mean[ch]                                            # (P,)
    istd_vec = 1.0 / std[ch]                                       # (P,)

    # fold CLIP mean/std into the patch embedding
    wpatch_eff = params["wpatch"] * istd_vec[:, None]              # (P, D)
    bpatch_eff = params["bpatch"] - mean_vec[None, :] @ wpatch_eff  # (1, D)

    # fuse wk|wv, then fold the patch embedding into the image K|V weight
    wkv = jnp.concatenate([params["wk"], params["wv"]], axis=1)    # (D, 2D)
    w_img = wpatch_eff @ wkv                                       # (P, 2D)
    b_kv = bpatch_eff @ wkv                                        # (1, 2D)

    # CLS query, pre-projected and pre-scaled
    qcls = params["queries"][0:1]                                  # (1, D)
    q0 = (qcls @ params["wq"]) * (1.0 / jnp.sqrt(jnp.float32(D)))  # (1, D)

    # fold output projection + residual + vision_proj
    wo_proj = params["wo"] @ params["wproj"]                       # (D, DP)
    b_out = qcls @ params["wproj"] + params["bproj"]               # (1, DP)

    w_rest = jnp.zeros((WREST_ROWS, WREST_W), jnp.float32)
    w_rest = w_rest.at[:D, :D2].set(wkv)
    w_rest = w_rest.at[:D, D2:D2 + DP].set(wo_proj)
    w_rest = w_rest.at[ROW_Q0, :D].set(q0[0])
    w_rest = w_rest.at[ROW_BKV, :D2].set(b_kv[0])
    w_rest = w_rest.at[ROW_BOUT, :DP].set(b_out[0])

    return {"tok_emb": params["tok_emb"], "w_img": w_img, "w_rest": w_rest}


# --------------------------------- wrapper -----------------------------------
@jax.jit
def blip2_forward(image, text_ids, packed):
    """image: [B, C, H, W] float32 (NCHW, raw pixels).  text_ids: [T] int32.
    Returns: [B, DP] L2-normalized multimodal CLS features."""
    b = image.shape[0]

    # ---- patchify NCHW -> [B*N, C*p*p] (glue; mean/std folded into w_img) ----
    patches = image.reshape(b, C, H // PATCH, PATCH, W // PATCH, PATCH)
    patches = patches.transpose(0, 2, 4, 1, 3, 5).reshape(b * N, P)

    # ---- txt_processors['eval'] + token embedding lookup (glue) ----
    text_emb = jnp.take(packed["tok_emb"], text_ids, axis=0)      # (T, D)

    flops = 2 * (b * N * P * D2 + T * D * D2 + D * (b * N + T)
                 + b * (b * N) * D + b * T * D + b * D * DP)
    bytes_accessed = 4 * (b * N * P + T * D + P * D2
                          + WREST_ROWS * WREST_W + b * DP)
    cost = pl.CostEstimate(flops=flops,
                           transcendentals=b * (b * N + T),
                           bytes_accessed=bytes_accessed)

    # Single invocation, no grid, whole arrays resident in VMEM (<100 KiB).
    return pl.pallas_call(
        blip2_kernel,
        out_shape=jax.ShapeDtypeStruct((b, DP), jnp.float32),
        cost_estimate=cost,
    )(patches, text_emb, packed["w_img"], packed["w_rest"])


# ------------------------------ pure-JAX reference ---------------------------
def blip2_ref(image, text_ids, params):
    mean = jnp.array([0.48145466, 0.4578275, 0.40821073], jnp.float32)
    std = jnp.array([0.26862954, 0.26130258, 0.27577711], jnp.float32)
    img = (image - mean[None, :, None, None]) / std[None, :, None, None]
    b, c, h, w = img.shape
    patches = img.reshape(b, c, h // PATCH, PATCH, w // PATCH, PATCH)
    patches = patches.transpose(0, 2, 4, 1, 3, 5).reshape(b, N, P)
    text_emb = jnp.take(params["tok_emb"], text_ids, axis=0)

    img_emb = patches @ params["wpatch"] + params["bpatch"]
    kv_in = jnp.concatenate(
        [img_emb, jnp.broadcast_to(text_emb, (b, T, D))], axis=1)
    q = params["queries"] @ params["wq"]
    k = kv_in @ params["wk"]
    v = kv_in @ params["wv"]
    s = jnp.einsum("qd,bkd->bqk", q, k) / jnp.sqrt(jnp.float32(D))
    p = jax.nn.softmax(s, axis=-1)
    attn = jnp.einsum("bqk,bkd->bqd", p, v)
    mm = attn @ params["wo"] + params["queries"]
    proj = mm @ params["wproj"] + params["bproj"]
    cls = proj[:, 0, :]
    nrm = jnp.maximum(jnp.linalg.norm(cls, axis=-1, keepdims=True), 1e-12)
    return cls / nrm


# ----------------------------------- main ------------------------------------
if __name__ == "__main__":
    key = jax.random.PRNGKey(0)
    k_img, k_par = jax.random.split(key)
    image = jax.random.uniform(k_img, (B, C, H, W), jnp.float32)  # NCHW pixels
    raw_params = init_params(k_par)
    packed = pack_params(raw_params)

    # text=None branch -> fixed "a photo of" token ids (synthetic)
    text_ids = jnp.array([3, 17, 29, 5], jnp.int32)

    out = blip2_forward(image, text_ids, packed)
    out = jax.block_until_ready(out)

    ref = blip2_ref(image, text_ids, raw_params)
    assert out.shape == (B, DP)
    max_err = jnp.max(jnp.abs(out - ref))
    assert jnp.allclose(out, ref, atol=1e-5, rtol=1e-5), (
        f"mismatch: max abs err {max_err}")
    # output rows are unit-norm
    assert jnp.allclose(jnp.linalg.norm(out, axis=-1), 1.0, atol=1e-5)

    print("KERNEL_OK")
</pallas_src>

<mosaic_0001>
module attributes {stable_mosaic.version = 11 : i64} {
  func.func @blip2_kernel(%arg0: memref<8x192xf32, #tpu.memory_space<vmem>>, %arg1: memref<4x32xf32, #tpu.memory_space<vmem>>, %arg2: memref<192x64xf32, #tpu.memory_space<vmem>>, %arg3: memref<35x80xf32, #tpu.memory_space<vmem>>, %arg4: memref<2x16xf32, #tpu.memory_space<vmem>>) attributes {dimension_semantics = [], scalar_prefetch = 0 : i64, scratch_operands = 0 : i64, tpu.core_type = #tpu.core_type<tc>} {
    %c0 = arith.constant 0 : index
    %c0_0 = arith.constant 0 : index
    %0 = vector.load %arg3[%c0, %c0_0] : memref<35x80xf32, #tpu.memory_space<vmem>>, vector<35x80xf32>
    %1 = vector.extract_strided_slice %0 {offsets = [0, 0], sizes = [32, 64], strides = [1, 1]} : vector<35x80xf32> to vector<32x64xf32>
    %2 = vector.extract_strided_slice %0 {offsets = [0, 64], sizes = [32, 16], strides = [1, 1]} : vector<35x80xf32> to vector<32x16xf32>
    %3 = vector.extract_strided_slice %0 {offsets = [32, 0], sizes = [1, 32], strides = [1, 1]} : vector<35x80xf32> to vector<1x32xf32>
    %4 = vector.extract_strided_slice %0 {offsets = [33, 0], sizes = [1, 64], strides = [1, 1]} : vector<35x80xf32> to vector<1x64xf32>
    %5 = vector.extract_strided_slice %0 {offsets = [34, 0], sizes = [1, 16], strides = [1, 1]} : vector<35x80xf32> to vector<1x16xf32>
    %c0_1 = arith.constant 0 : index
    %c0_2 = arith.constant 0 : index
    %6 = vector.load %arg0[%c0_1, %c0_2] : memref<8x192xf32, #tpu.memory_space<vmem>>, vector<8x192xf32>
    %c0_3 = arith.constant 0 : index
    %c0_4 = arith.constant 0 : index
    %7 = vector.load %arg2[%c0_3, %c0_4] : memref<192x64xf32, #tpu.memory_space<vmem>>, vector<192x64xf32>
    %cst = arith.constant dense<0.000000e+00> : vector<8x64xf32>
    %8 = tpu.matmul %6, %7, %cst {dimension_numbers = #tpu.dot_dimension_numbers<[1], [0], [0], [1], [0, 0, 1, 1], [], []>} : vector<8x192xf32>, vector<192x64xf32>, vector<8x64xf32> -> vector<8x64xf32>
    %9 = vector.broadcast %4 : vector<1x64xf32> to vector<8x64xf32>
    %10 = arith.addf %8, %9 : vector<8x64xf32>
    %11 = vector.extract_strided_slice %10 {offsets = [0, 0], sizes = [8, 32], strides = [1, 1]} : vector<8x64xf32> to vector<8x32xf32>
    %12 = vector.extract_strided_slice %10 {offsets = [0, 32], sizes = [8, 32], strides = [1, 1]} : vector<8x64xf32> to vector<8x32xf32>
    %c0_5 = arith.constant 0 : index
    %c0_6 = arith.constant 0 : index
    %13 = vector.load %arg1[%c0_5, %c0_6] : memref<4x32xf32, #tpu.memory_space<vmem>>, vector<4x32xf32>
    %cst_7 = arith.constant dense<0.000000e+00> : vector<4x64xf32>
    %14 = tpu.matmul %13, %1, %cst_7 {dimension_numbers = #tpu.dot_dimension_numbers<[1], [0], [0], [1], [0, 0, 1, 1], [], []>} : vector<4x32xf32>, vector<32x64xf32>, vector<4x64xf32> -> vector<4x64xf32>
    %15 = vector.extract_strided_slice %14 {offsets = [0, 0], sizes = [4, 32], strides = [1, 1]} : vector<4x64xf32> to vector<4x32xf32>
    %16 = vector.extract_strided_slice %14 {offsets = [0, 32], sizes = [4, 32], strides = [1, 1]} : vector<4x64xf32> to vector<4x32xf32>
    %cst_8 = arith.constant dense<0.000000e+00> : vector<1x8xf32>
    %17 = tpu.matmul %3, %11, %cst_8 {dimension_numbers = #tpu.dot_dimension_numbers<[1], [1], [0], [0], [0, 0, 1, 0], [], []>} : vector<1x32xf32>, vector<8x32xf32>, vector<1x8xf32> -> vector<1x8xf32>
    %cst_9 = arith.constant dense<0.000000e+00> : vector<1x4xf32>
    %18 = tpu.matmul %3, %15, %cst_9 {dimension_numbers = #tpu.dot_dimension_numbers<[1], [1], [0], [0], [0, 0, 1, 0], [], []>} : vector<1x32xf32>, vector<4x32xf32>, vector<1x4xf32> -> vector<1x4xf32>
    %19 = tpu.iota {dimensions = array<i32: 0>} : vector<2x8xi32>
    %20 = tpu.iota {dimensions = array<i32: 1>} : vector<2x8xi32>
    %c4_i32 = arith.constant 4 : i32
    %21 = vector.broadcast %c4_i32 : i32 to vector<2x8xi32>
    %22 = arith.muli %19, %21 : vector<2x8xi32>
    %23 = arith.cmpi sge, %20, %22 : vector<2x8xi32>
    %c1_i32 = arith.constant 1 : i32
    %24 = vector.broadcast %c1_i32 : i32 to vector<2x8xi32>
    %25 = arith.addi %19, %24 : vector<2x8xi32>
    %c4_i32_10 = arith.constant 4 : i32
    %26 = vector.broadcast %c4_i32_10 : i32 to vector<2x8xi32>
    %27 = arith.muli %25, %26 : vector<2x8xi32>
    %28 = arith.cmpi slt, %20, %27 : vector<2x8xi32>
    %29 = arith.andi %23, %28 : vector<2x8xi1>
    %30 = vector.shape_cast %17 : vector<1x8xf32> to vector<1x8xf32>
    %31 = vector.broadcast %30 : vector<1x8xf32> to vector<2x8xf32>
    %cst_11 = arith.constant -1.000000e+30 : f32
    %32 = vector.broadcast %cst_11 : f32 to vector<2x8xf32>
    %33 = arith.select %29, %31, %32 : vector<2x8xi1>, vector<2x8xf32>
    %cst_12 = arith.constant dense<0xFF800000> : vector<2xf32>
    %34 = vector.multi_reduction <maximumf>, %33, %cst_12 [1] : vector<2x8xf32> to vector<2xf32>
    %35 = vector.shape_cast %34 : vector<2xf32> to vector<2x1xf32>
    %cst_13 = arith.constant dense<0xFF800000> : vector<1xf32>
    %36 = vector.multi_reduction <maximumf>, %18, %cst_13 [1] : vector<1x4xf32> to vector<1xf32>
    %37 = vector.shape_cast %36 : vector<1xf32> to vector<1x1xf32>
    %38 = vector.broadcast %37 : vector<1x1xf32> to vector<2x1xf32>
    %39 = arith.maximumf %35, %38 : vector<2x1xf32>
    %40 = vector.broadcast %39 : vector<2x1xf32> to vector<2x8xf32>
    %41 = arith.subf %33, %40 : vector<2x8xf32>
    %42 = math.exp %41 : vector<2x8xf32>
    %43 = vector.broadcast %18 : vector<1x4xf32> to vector<2x4xf32>
    %44 = vector.broadcast %39 : vector<2x1xf32> to vector<2x4xf32>
    %45 = arith.subf %43, %44 : vector<2x4xf32>
    %46 = math.exp %45 : vector<2x4xf32>
    %cst_14 = arith.constant dense<0.000000e+00> : vector<2xf32>
    %47 = vector.multi_reduction <add>, %42, %cst_14 [1] : vector<2x8xf32> to vector<2xf32>
    %48 = vector.shape_cast %47 : vector<2xf32> to vector<2x1xf32>
    %cst_15 = arith.constant dense<0.000000e+00> : vector<2xf32>
    %49 = vector.multi_reduction <add>, %46, %cst_15 [1] : vector<2x4xf32> to vector<2xf32>
    %50 = vector.shape_cast %49 : vector<2xf32> to vector<2x1xf32>
    %51 = arith.addf %48, %50 : vector<2x1xf32>
    %cst_16 = arith.constant dense<0.000000e+00> : vector<2x32xf32>
    %52 = tpu.matmul %42, %12, %cst_16 {dimension_numbers = #tpu.dot_dimension_numbers<[1], [0], [0], [1], [0, 0, 1, 1], [], []>} : vector<2x8xf32>, vector<8x32xf32>, vector<2x32xf32> -> vector<2x32xf32>
    %cst_17 = arith.constant dense<0.000000e+00> : vector<2x32xf32>
    %53 = tpu.matmul %46, %16, %cst_17 {dimension_numbers = #tpu.dot_dimension_numbers<[1], [0], [0], [1], [0, 0, 1, 1], [], []>} : vector<2x4xf32>, vector<4x32xf32>, vector<2x32xf32> -> vector<2x32xf32>
    %54 = arith.addf %52, %53 : vector<2x32xf32>
    %55 = tpu.reciprocal %51 : vector<2x1xf32> -> vector<2x1xf32>
    %56 = vector.broadcast %55 : vector<2x1xf32> to vector<2x32xf32>
    %57 = arith.mulf %54, %56 : vector<2x32xf32>
    %cst_18 = arith.constant dense<0.000000e+00> : vector<2x16xf32>
    %58 = tpu.matmul %57, %2, %cst_18 {dimension_numbers = #tpu.dot_dimension_numbers<[1], [0], [0], [1], [0, 0, 1, 1], [], []>} : vector<2x32xf32>, vector<32x16xf32>, vector<2x16xf32> -> vector<2x16xf32>
    %59 = vector.broadcast %5 : vector<1x16xf32> to vector<2x16xf32>
    %60 = arith.addf %58, %59 : vector<2x16xf32>
    %61 = arith.mulf %60, %60 : vector<2x16xf32>
    %cst_19 = arith.constant dense<0.000000e+00> : vector<2xf32>
    %62 = vector.multi_reduction <add>, %61, %cst_19 [1] : vector<2x16xf32> to vector<2xf32>
    %63 = vector.shape_cast %62 : vector<2xf32> to vector<2x1xf32>
    %64 = math.sqrt %63 : vector<2x1xf32>
    %cst_20 = arith.constant 9.99999996E-13 : f32
    %65 = vector.broadcast %cst_20 : f32 to vector<2x1xf32>
    %66 = arith.maximumf %64, %65 : vector<2x1xf32>
    %67 = vector.broadcast %66 : vector<2x1xf32> to vector<2x16xf32>
    %68 = arith.divf %60, %67 : vector<2x16xf32>
    %c0_21 = arith.constant 0 : index
    %c0_22 = arith.constant 0 : index
    %69 = vector.load %arg4[%c0_21, %c0_22] : memref<2x16xf32, #tpu.memory_space<vmem>>, vector<2x16xf32>
    tpu.vector_store %arg4[%c0_21, %c0_22], %68 {strides = array<i32>} : memref<2x16xf32, #tpu.memory_space<vmem>>, vector<2x16xf32>,
    return
  }
}

</mosaic_0001>

<bundles_post_ra>
// kernel: blip2_forward.1
= control target key start
LH: loop header
LB: loop body
LE: loop exit
PB: predicated region body
PF: predicated region fallthrough
CT: control target
= control target key end

     0   :  { %v785_v1 = vmov 0.0   ;;  %vm786_vm0 = vmmov 0   ;;  %s1001_s0 = inlined_call_operand.vmem [shape: f32[8,192], index: 0, kind: input, shape index: {}]   ;;  %s1002_s1 = inlined_call_operand.vmem [shape: f32[4,32], index: 1, kind: input, shape index: {}]   ;;  %s1003_s2 = inlined_call_operand.vmem [shape: f32[192,64], index: 2, kind: input, shape index: {}]   ;;  %s1004_s3 = inlined_call_operand.vmem [shape: f32[35,80], index: 3, kind: input, shape index: {}]   ;;  %s1005_s4 = inlined_call_operand.hbm [shape: f32[2,16], index: 4, kind: output, shape index: {}]  }
   0x1   :  { %v40_v0 = vld [vmem:[%s1003_s2 + $0x78] sm:$0xff]  ;;  %57 = vmatprep.subr.mxu0 %v785_v1  ;;  %v39_v2 = vld [vmem:[%s1003_s2 + $0x70] sm:$0xff]  ;;  %706 = vmatprep.subr.mxu1 %v785_v1  ;;  %v38_v3 = vld [vmem:[%s1003_s2 + $0x68] sm:$0xff] }
   0x2   :  { %58 = vmatpush1.msra.mxu0 %v40_v0  ;;  %714 = vmatprep.mubr.msk.f32.mxu1 %vm786_vm0, %v785_v1  ;;  %v37_v4 = vld [vmem:[%s1003_s2 + $0x60] sm:$0xff]  ;;  %v836_v5 = vld [vmem:[%s1004_s3 + $0x18] sm:$0xff]  ;;  %v846_v7 = vld [vmem:[%s1004_s3 + $0x10] sm:$0xff] }
   0x3   :  { %59 = vmatprep.subr.mxu0 %v785_v1  ;;  %v36_v6 = vld [vmem:[%s1003_s2 + $0x58] sm:$0xff]  ;;  %707 = vmatpush3.msra.mxu1 %v836_v5  ;;  %v852_v8 = vld [vmem:[%s1004_s3 + $0x8] sm:$0xff]  ;;  %v35_v9 = vld [vmem:[%s1003_s2 + $0x50] sm:$0xff] }
   0x4   :  { %60 = vmatpush1.msra.mxu0 %v39_v2  ;;  %708 = vmatprep.subr.mxu1 %v785_v1  ;;  %v863_v10 = vld [vmem:[%s1004_s3] sm:$0xff] }
   0x5   :  { %61 = vmatprep.subr.mxu0 %v785_v1  ;;  %709 = vmatpush3.msra.mxu1 %v846_v7 }
   0x6   :  { %62 = vmatpush1.msra.mxu0 %v38_v3  ;;  %710 = vmatprep.subr.mxu1 %v785_v1 }
   0x7   :  { %63 = vmatprep.subr.mxu0 %v785_v1 }
   0x8   :  { %64 = vmatpush1.msra.mxu0 %v37_v4 }
   0x9   :  { %65 = vmatprep.subr.mxu0 %v785_v1 }
   0xa   :  { %66 = vmatpush1.msra.mxu0 %v36_v6 }
   0xb   :  { %9 = vsyncpa [#allocation3], 0  ;;  %67 = vmatprep.subr.mxu0 %v785_v1  ;;  %v34_v11 = vld [vmem:[%s1003_s2 + $0x48] sm:$0xff]  ;;  %711 = vmatpush3.msra.mxu1 %v852_v8  ;;  %v127_v12 = vld [vmem:[%s1002_s1] sm:$0xf]  ;;  %vm128_vm1 = vcmask 261120   ;;  %v49_v34 = vlaneseq }
   0xc   :  { %68 = vmatpush1.msra.mxu0 %v35_v9  ;;  %712 = vmatprep.subr.mxu1 %v785_v1  ;;  %v24_v13 = vld [vmem:[%s1001_s0 + $0x8] sm:$0xff]  ;;  %vm53_vm2 = vcmask 523264   ;;  %v33_v14 = vld [vmem:[%s1003_s2 + $0x40] sm:$0xff]  ;;  %v32_v15 = vld [vmem:[%s1003_s2 + $0x38] sm:$0xff]  ;;  %s787_s23 = smov 96   ;;  %vm403_vm3 = vcmask 1043456  }
   0xd   :  { %69 = vmatprep.subr.mxu0 %v785_v1  ;;  %713 = vmatpush3.msra.mxu1 %v863_v10  ;;  %v31_v16 = vld [vmem:[%s1003_s2 + $0x30] sm:$0xff]  ;;  %v30_v17 = vld [vmem:[%s1003_s2 + $0x28] sm:$0xff]  ;;  %v29_v18 = vld [vmem:[%s1003_s2 + $0x20] sm:$0xff]  ;;  %v954_v35 = vshrl.u32 %v49_v34, 7  ;;  %v354_v44 = vand.u32 127, %v49_v34  ;;  %vm370_vm6 = vcmask 24576  }
   0xe   :  { %70 = vmatpush1.msra.mxu0 %v34_v11  ;;  %715 = vmatmul.mubr.msk.f32.vlgmr.msra.gmra.mxu1 %vm128_vm1, %v127_v12  ;;  %v28_v19 = vld [vmem:[%s1003_s2 + $0x18] sm:$0xff]  ;;  %v27_v20 = vld [vmem:[%s1003_s2 + $0x10] sm:$0xff]  ;;  %v26_v21 = vld [vmem:[%s1003_s2 + $0x8] sm:$0xff]  ;;  %vm366_vm8 = vcmask 58368   ;;  %vm399_vm9 = vcmask 31744   ;;  %vm392_vm10 = vcmask 25600  }
   0xf   :  { %71 = vmatprep.subr.mxu0 %v785_v1  ;;  %678 = vmatprep.mubr.msk.f32.mxu0 %vm53_vm2, %v24_v13  ;;  %v25_v22 = vld [vmem:[%s1003_s2] sm:$0xff]  ;;  %v48_v23 = vld [vmem:[%s1003_s2 + $0xb8] sm:$0xff]  ;;  %v47_v24 = vld [vmem:[%s1003_s2 + $0xb0] sm:$0xff]  ;;  %v51_v36 = vsub.s32 1, %v954_v35  ;;  %v357_v43 = vadd.s32 1, %v954_v35  ;;  %v355_v45 = vmul.u32 4, %v954_v35 }
  0x10   :  { %72 = vmatpush1.msra.mxu0 %v33_v14  ;;  %717 = vmatprep.subr.mxu1 %v785_v1  ;;  %v46_v25 = vld [vmem:[%s1003_s2 + $0xa8] sm:$0xff]  ;;  %v45_v26 = vld [vmem:[%s1003_s2 + $0xa0] sm:$0xff]  ;;  %v44_v27 = vld [vmem:[%s1003_s2 + $0x98] sm:$0xff]  ;;  %v363_v47 = vsub.s32 0, %v954_v35  ;;  %vm479_vm11 = vcmask 64512   ;;  %vm649_vm12 = vcmask 123904  }
  0x11   :  { %73 = vmatprep.subr.mxu0 %v785_v1  ;;  %719 = vmatprep.mubr.msk.f32.mxu1 %vm786_vm0, %v785_v1  ;;  %v43_v28 = vld [vmem:[%s1003_s2 + $0x90] sm:$0xff]  ;;  %v42_v29 = vld [vmem:[%s1003_s2 + $0x88] sm:$0xff]  ;;  %v41_v30 = vld [vmem:[%s1003_s2 + $0x80] sm:$0xff]  ;;  %v358_v46 = vmul.u32 4, %v357_v43  ;;  %vm356_vm4 = vcmp.ge.s32.totalorder %v354_v44, %v355_v45 }
  0x12   :  { %74 = vmatpush1.msra.mxu0 %v32_v15  ;;  %v23_v31 = vld [vmem:[%s1001_s0] sm:$0xff]  ;;  %s788_s0 = smov 64  }
  0x13   :  { %75 = vmatprep.subr.mxu0 %v785_v1  ;;  %v960_v37 = vld [vmem:[%s1004_s3 + $0x20] sm:$0x7]  ;;  %vm359_vm5 = vcmp.lt.s32.totalorder %v354_v44, %v358_v46  ;;  %s789_s3 = smov [#allocation2]  }
  0x14   :  { %76 = vmatpush1.msra.mxu0 %v31_v16  ;;  %v52_v38 = vrot.slane %v960_v37, %v51_v36  ;;  %vm360_vm7 = vmand %vm356_vm4, %vm359_vm5  ;;  %s670_s25 = sshll.u32 %s789_s3, 4  ;;  %s671_s25 = int_to_ptr.vmem [resolvable:$true] %s670_s25 }
  0x15   :  { %77 = vmatprep.subr.mxu0 %v785_v1  ;;  %s763_s26 = scalar_lea.vmem %s671_s25, 32  ;;  %p768_p1 = scmp.lt.s32.totalorder %s671_s25, %s671_s25 }
  0x16   :  { %78 = vmatpush1.msra.mxu0 %v30_v17  ;;  %p764_p0 = scmp.ne.s32.totalorder %s671_s25, %s763_s26  ;;  %p769_p2 = scmp.lt.s32.totalorder %s763_s26, %s763_s26 }
  0x17   :  { %79 = vmatprep.subr.mxu0 %v785_v1 }
  0x18   :  { %80 = vmatpush1.msra.mxu0 %v29_v18  ;;  %p770_p3 = por %p769_p2, %p768_p1 }
  0x19   :  { %81 = vmatprep.subr.mxu0 %v785_v1 }
  0x1a   :  { %82 = vmatpush1.msra.mxu0 %v28_v19  ;;  %p771_p4 = pnand %p770_p3, %p764_p0 }
  0x1b   :  { %83 = vmatprep.subr.mxu0 %v785_v1 }
  0x1c   :  { %84 = vmatpush1.msra.mxu0 %v27_v20 }
  0x1d   :  { %85 = vmatprep.subr.mxu0 %v785_v1 }
  0x1e   :  { %86 = vmatpush1.msra.mxu0 %v26_v21  ;;  %v557_v21 = vsub.s32 2, %v954_v35 }
  0x1f   :  { %87 = vmatprep.subr.mxu0 %v785_v1 }
  0x20   :  { %88 = vmatpush1.msra.mxu0 %v25_v22  ;;  %v558_v22 = vrot.slane %v960_v37, %v557_v21 }
  0x21   :  { %105 = vmatprep.subr.mxu0 %v785_v1 }
  0x22   :  { %106 = vmatpush2.msra.mxu0 %v48_v23 }
  0x23   :  { %107 = vmatprep.subr.mxu0 %v785_v1 }
  0x24   :  { %108 = vmatpush2.msra.mxu0 %v47_v24 }
  0x25   :  { %109 = vmatprep.subr.mxu0 %v785_v1 }
  0x26   :  { %110 = vmatpush2.msra.mxu0 %v46_v25 }
  0x27   :  { %111 = vmatprep.subr.mxu0 %v785_v1 }
  0x28   :  { %112 = vmatpush2.msra.mxu0 %v45_v26 }
  0x29   :  { %113 = vmatprep.subr.mxu0 %v785_v1 }
  0x2a   :  { %114 = vmatpush2.msra.mxu0 %v44_v27 }
  0x2b   :  { %115 = vmatprep.subr.mxu0 %v785_v1 }
  0x2c   :  { %116 = vmatpush2.msra.mxu0 %v43_v28 }
  0x2d   :  { %117 = vmatprep.subr.mxu0 %v785_v1 }
  0x2e   :  { %118 = vmatpush2.msra.mxu0 %v42_v29 }
  0x2f   :  { %119 = vmatprep.subr.mxu0 %v785_v1 }
  0x30   :  { %120 = vmatpush2.msra.mxu0 %v41_v30 }
  0x31   :  { %122 = vmatmul.mubr.f32.vlgmr.msra.gmra.mxu0 %v23_v31 }
  0xce   :  { %v198_v32 = vpop.f32.mrf.mxu1 }
  0xcf   :  { %397 = vrot.lane.b32.xlu1 %v198_v32, %s787_s23 }
  0xd0   :  { %v716_v33 = vpop.f32.mrf.mxu1 }
  0xf1   :  { %v123_v39 = vpop.f32.mrf.mxu0 }
  0xf2   :  { %v124_v40 = vadd.f32 %v123_v39, %v52_v38 }
  0xf3   :  { %v125_v41 = vpop.f32.mrf.mxu0 }
  0xf4   :  { %718 = vmatpush3.xpose.msk.msra.mxu1 %vm128_vm1, %v124_v40  ;;  %476 = vrot.lane.b32.xlu1 %v124_v40, %s787_s23 }
  0xf5   :  { %722 = vmatprep.subr.mxu1 %v785_v1 }
  0xf7   :  { %720 = vmatmul.mubr.msk.f32.vlgmr.msra.gmra.mxu1 %vm128_vm1, %v960_v37 }
  0xf8   :  { %723 = vmatpush3.xpose.msk.msra.mxu1 %vm128_vm1, %v198_v32  ;;  %724 = vmatprep.mubr.msk.f32.mxu1 %vm786_vm0, %v785_v1 }
  0xf9   :  { %727 = vmatprep.subr.mxu1 %v785_v1 }
  0xfb   :  { %725 = vmatmul.mubr.msk.f32.vlgmr.msra.gmra.mxu1 %vm128_vm1, %v960_v37 }
  0xfc   :  { %729 = vmatprep.mubr.msk.f32.mxu1 %vm786_vm0, %v785_v1 }
 0x141   :  { %v398_v42 = vpop.permute.xlu1 %397 }
 0x142   :  { %728 = vmatpush3.msk.msra.mxu1 %vm403_vm3, %v398_v42 }
 0x143   :  { %732 = vmatprep.subr.mxu1 %v785_v1 }
 0x166   :  { %v477_v6 = vpop.permute.xlu1 %476 }
 0x1b7   :  { %v274_v48 = vpop.f32.mrf.mxu1 }
 0x1b8   :  { %v364_v49 = vrot.slane %v274_v48, %v363_v47 }
 0x1b9   :  { %v721_v50 = vpop.f32.mrf.mxu1 }
 0x1ba   :  { %v365_v54 = vsel %vm360_vm7, %v364_v49, -1e+30 }
 0x1bb   :  { %v347_v51 = vpop.f32.mrf.mxu1  ;;  %v367_v55 = vsel %vm366_vm8, %v365_v54, -inf }
 0x1bc   :  { %v371_v52 = vsel %vm370_vm6, %v347_v51, -inf  ;;  %v385_v59 = vrot.slane %v347_v51, %v363_v47 }
 0x1bd   :  { %372 = vmax.xlane.f32.xlu0 %v371_v52  ;;  %v726_v53 = vpop.f32.mrf.mxu1 }
 0x1c1   :  { %368 = vmax.xlane.f32.xlu0 %v367_v55 }
 0x246   :  { %v373_v56 = vpop.xlane.xlu0 %372 }
 0x247   :  { %v377_v57 = vrot.slane %v373_v56, %v363_v47 }
 0x24a   :  { %v369_v58 = vpop.xlane.xlu0 %368 }
 0x24b   :  { %v378_v60 = vmax.f32 %v369_v58, %v377_v57 }
 0x24d   :  { %v379_v61 = vsub.f32 %v365_v54, %v378_v60  ;;  %v386_v62 = vsub.f32 %v385_v59, %v378_v60 }
 0x24f   :  { %v380_v63 = vmul.f32 1.442695, %v379_v61  ;;  %v387_v0 = vmul.f32 1.442695, %v386_v62 }
 0x251   :  { %753 = vpow2.f32 %v380_v63 }
 0x252   :  { %755 = vpow2.f32 %v387_v0 }
 0x25e   :  { %v754_v2 = vpop.eup %753 }
 0x25f   :  { %v756_v3 = vpop.eup %755  ;;  %v389_v4 = vsel %vm366_vm8, %v754_v2, 0.0 }
 0x260   :  { %730 = vmatmul.mubr.msk.f32.vlgmr.msra.gmra.mxu1 %vm399_vm9, %v756_v3  ;;  %v393_v9 = vsel %vm392_vm10, %v756_v3, 0.0  ;;  %390 = vadd.xlane.f32.xlu0 %v389_v4 }
 0x261   :  { %733 = vmatpush3.msra.mxu1 %v477_v6  ;;  %394 = vadd.xlane.f32.xlu1 %v393_v9 }
 0x262   :  { %734 = vmatprep.mubr.msk.f32.mxu1 %vm786_vm0, %v785_v1  ;;  %737 = vmatprep.subr.mxu1 %v785_v1 }
 0x264   :  { %735 = vmatmul.mubr.msk.f32.vlgmr.msra.gmra.mxu1 %vm479_vm11, %v754_v2 }
 0x265   :  { %745 = vmatprep.mubr.msk.f32.mxu1 %vm786_vm0, %v785_v1 }
 0x276   :  { %569 = vrot.lane.b32.xlu0 %v836_v5, %s788_s0 }
 0x27a   :  { %567 = vrot.lane.b32.xlu0 %v846_v7, %s788_s0 }
 0x27e   :  { %565 = vrot.lane.b32.xlu0 %v852_v8, %s788_s0 }
 0x282   :  { %563 = vrot.lane.b32.xlu0 %v863_v10, %s788_s0 }
 0x2e9   :  { %v391_v11 = vpop.xlane.xlu0 %390 }
 0x2ea   :  { %v395_v7 = vpop.xlane.xlu1 %394 }
 0x2eb   :  { %v396_v15 = vadd.f32 %v395_v7, %v391_v11 }
 0x2ed   :  { %v570_v12 = vpop.permute.xlu0 %569  ;;  %757 = vrcp.f32 %v396_v15 }
 0x2ee   :  { %738 = vmatpush3.msra.mxu1 %v570_v12 }
 0x2ef   :  { %739 = vmatprep.subr.mxu1 %v785_v1 }
 0x2f1   :  { %v568_v13 = vpop.permute.xlu0 %567 }
 0x2f2   :  { %740 = vmatpush3.msra.mxu1 %v568_v13 }
 0x2f3   :  { %741 = vmatprep.subr.mxu1 %v785_v1 }
 0x2f5   :  { %v566_v14 = vpop.permute.xlu0 %565 }
 0x2f6   :  { %742 = vmatpush3.msra.mxu1 %v566_v14 }
 0x2f7   :  { %743 = vmatprep.subr.mxu1 %v785_v1 }
 0x2f9   :  { %v564_v5 = vpop.permute.xlu0 %563 }
 0x2fa   :  { %744 = vmatpush3.msra.mxu1 %v564_v5  ;;  %v758_v18 = vpop.eup %757 }
 0x320   :  { %v472_v8 = vpop.f32.mrf.mxu1 }
 0x322   :  { %v731_v10 = vpop.f32.mrf.mxu1 }
 0x324   :  { %v549_v16 = vpop.f32.mrf.mxu1 }
 0x325   :  { %v550_v17 = vadd.f32 %v549_v16, %v472_v8 }
 0x326   :  { %v736_v19 = vpop.f32.mrf.mxu1 }
 0x327   :  { %v554_v20 = vmul.f32 %v758_v18, %v550_v17 }
 0x329   :  { %746 = vmatmul.mubr.msk.f32.vlgmr.msra.gmra.mxu1 %vm128_vm1, %v554_v20 }
 0x3e9   :  { %v644_v23 = vpop.f32.mrf.mxu1 }
 0x3ea   :  { %v645_v1 = vadd.f32 %v644_v23, %v558_v22 }
 0x3eb   :  { %v747_v24 = vpop.f32.mrf.mxu1 }
 0x3ec   :  { %v648_v25 = vmul.f32 %v645_v1, %v645_v1 }
 0x3ee   :  { %v650_v26 = vsel %vm649_vm12, %v648_v25, 0.0 }
 0x3ef   :  { %651 = vadd.xlane.f32.xlu1 %v650_v26 }
 0x478   :  { %v652_v27 = vpop.xlane.xlu1 %651 }
 0x479   :  { %759 = vrsqrt.f32 %v652_v27  ;;  %vm655_vm13 = vcmp.eq.f32.partialorder %v652_v27, inf  ;;  %v658_v30 = vand.u32 2147483648, %v652_v27  ;;  %vm657_vm14 = vcmp.eq.f32.partialorder %v652_v27, 0.0 }
 0x486   :  { %v760_v28 = vpop.eup %759 }
 0x487   :  { %v654_v29 = vmul.f32 %v760_v28, %v652_v27 }
 0x489   :  { %v656_v31 = vsel %vm655_vm13, %v652_v27, %v654_v29 }
 0x48a   :  { %v659_v32 = vsel %vm657_vm14, %v658_v30, %v656_v31 }
 0x48b   :  { %v660_v33 = vmax.f32 %v659_v32, 1e-12 }
 0x48d   :  { %761 = vrcp.f32 %v660_v33 }
 0x49a   :  { %v762_v34 = vpop.eup %761 }
 0x49b   :  { %v662_v35 = vmul.f32 %v762_v34, %v645_v1 }
 0x49d   :  { %663 = vst.msk [vmem:[#allocation2] sm:$0x3] %vm649_vm12, %v662_v35 }
 0x49e   :  { %774 = shalt.err (!%p771_p4)
}
 0x49f   :  { %673 = dma.vmem_to_hbm [thread:$0]  %s671_s25, 32, %s1005_s4, [#allocation3]  }
 0x4a0   :  { %783 = dma.done.wait [#allocation3], 32  }
 0x4a1   :  { %784 = vsyncadd [#allocation3], 4294967264 }
 0x4a2   :  { %677 = vsyncpa [#allocation3], 1 }

</bundles_post_ra>
